<compile_context>
chip_gen: v5e
topology: v5e:2x2
jax: 0.10.0
libtpu: 0.0.40
codegen_flags: <defaults>
</compile_context>

<pallas_src>
import jax
import jax.numpy as jnp
from jax.experimental import pallas as pl
from jax.experimental.pallas import tpu as pltpu

_H1_PAD = 512   # 400 padded up to a multiple of 128
_H2_PAD = 384   # 300 padded up to a multiple of 128


def _critic_kernel(s_ref, a_ref, w1s_ref, w1a_ref, b1_ref, w2_ref, b2_ref,
                   w3_ref, b3_ref, o_ref):
    wdt = w1s_ref.dtype                                      # bf16 or f32 weights
    s = s_ref[...].astype(wdt)                               # [Bt, S]
    a = a_ref[...].astype(wdt)                               # [Bt, A]

    # fc1 with fused concat:  concat([s, a], 1) @ w1 == s @ w1_s + a @ w1_a
    h1 = (jnp.dot(s, w1s_ref[...], preferred_element_type=jnp.float32) +
          jnp.dot(a, w1a_ref[...], preferred_element_type=jnp.float32))
    h1 = jnp.maximum(h1 + b1_ref[...], 0.0)                  # [Bt, 512]  f32

    # fc2
    h2 = jnp.dot(h1.astype(wdt), w2_ref[...],
                 preferred_element_type=jnp.float32)
    h2 = jnp.maximum(h2 + b2_ref[...], 0.0)                  # [Bt, 384]  f32

    # fc3: single output column -> VPU multiply + lane reduction (no MXU pass)
    q = jnp.sum(h2 * w3_ref[...], axis=-1, keepdims=True) + b3_ref[...]
    o_ref[...] = q.astype(o_ref.dtype)                       # [Bt, 1]


def prepare_critic_params(params, state_dim, compute_dtype=jnp.float32):
    """Split / zero-pad / cast nn.Linear-layout params into the kernel layout."""
    w1, b1 = params["w1"], params["b1"]          # [S+A, 400], [1, 400]
    w2, b2 = params["w2"], params["b2"]          # [400, 300], [1, 300]
    w3, b3 = params["w3"], params["b3"]          # [300, 1],   [1, 1]

    pad_c = lambda x, n: jnp.pad(x, ((0, 0), (0, n - x.shape[1])))
    pad_r = lambda x, n: jnp.pad(x, ((0, n - x.shape[0]), (0, 0)))

    return dict(
        w1_s=pad_c(w1[:state_dim], _H1_PAD).astype(compute_dtype),
        w1_a=pad_c(w1[state_dim:], _H1_PAD).astype(compute_dtype),
        b1=pad_c(b1, _H1_PAD).astype(jnp.float32),
        w2=pad_c(pad_r(w2, _H1_PAD), _H2_PAD).astype(compute_dtype),
        b2=pad_c(b2, _H2_PAD).astype(jnp.float32),
        w3=pad_c(w3.T, _H2_PAD).astype(jnp.float32),   # [1, 384] row vector
        b3=b3.astype(jnp.float32),                     # [1, 1]
    )


def critic_forward(state, action, kp):
    """state: [B, state_dim], action: [B, action_dim] -> q: [B, 1] (f32)."""
    B, S = state.shape
    A = action.shape[1]
    state = state.astype(jnp.float32)
    action = action.astype(jnp.float32)

    # Batch tiling: training-size batches get a parallel grid over rows;
    # small batches run as one block.
    if B >= 512 and B % 256 == 0:
        block_b = 256
    elif B >= 128 and B % 128 == 0:
        block_b = 128
    else:
        block_b = B
    grid = (B // block_b,)

    row_spec = lambda d: pl.BlockSpec((block_b, d), lambda i: (i, 0))
    full_spec = lambda x: pl.BlockSpec(x.shape, lambda i: (0, 0))  # VMEM-resident

    return pl.pallas_call(
        _critic_kernel,
        out_shape=jax.ShapeDtypeStruct((B, 1), jnp.float32),
        grid=grid,
        in_specs=[
            row_spec(S), row_spec(A),
            full_spec(kp["w1_s"]), full_spec(kp["w1_a"]), full_spec(kp["b1"]),
            full_spec(kp["w2"]), full_spec(kp["b2"]),
            full_spec(kp["w3"]), full_spec(kp["b3"]),
        ],
        out_specs=row_spec(1),
        compiler_params=pltpu.CompilerParams(
            dimension_semantics=("parallel",)),
    )(state, action, kp["w1_s"], kp["w1_a"], kp["b1"],
      kp["w2"], kp["b2"], kp["w3"], kp["b3"])


def init_critic_params(key, state_dim, action_dim):
    """Deterministic init mimicking nn.Linear default (U[-1/sqrt(fan_in), +])."""
    dims = [(state_dim + action_dim, 400), (400, 300), (300, 1)]
    params = {}
    for i, (fan_in, fan_out) in enumerate(dims, start=1):
        key, kw, kb = jax.random.split(key, 3)
        bound = 1.0 / jnp.sqrt(fan_in)
        params[f"w{i}"] = jax.random.uniform(
            kw, (fan_in, fan_out), jnp.float32, -bound, bound)
        params[f"b{i}"] = jax.random.uniform(
            kb, (1, fan_out), jnp.float32, -bound, bound)
    return params


def critic_ref(state, action, params):
    """Plain-JAX reference (unpadded, f32) for correctness check."""
    x = jnp.concatenate([state, action], axis=1)
    h = jax.nn.relu(x @ params["w1"] + params["b1"])
    h = jax.nn.relu(h @ params["w2"] + params["b2"])
    return h @ params["w3"] + params["b3"]


def default_compute_dtype():
    """bf16 weights on v6e/v7x; f32 on v5e and older."""
    try:
        kind = jax.devices()[0].device_kind.lower()
    except Exception:
        return jnp.float32
    if any(v in kind for v in ("v2", "v3", "v4", "v5")):
        return jnp.float32
    return jnp.bfloat16


if __name__ == "__main__":
    # Small, gym-ish shapes: e.g. a MuJoCo env with 17-dim state, 6-dim action.
    batch, state_dim, action_dim = 8, 17, 6

    key = jax.random.PRNGKey(0)
    k_params, k_state, k_action = jax.random.split(key, 3)
    params = init_critic_params(k_params, state_dim, action_dim)
    state = jax.random.normal(k_state, (batch, state_dim), jnp.float32)
    action = jax.random.normal(k_action, (batch, action_dim), jnp.float32)

    compute_dtype = default_compute_dtype()
    kparams = prepare_critic_params(params, state_dim, compute_dtype)

    q = critic_forward(state, action, kparams)
    q = jax.block_until_ready(q)

    q_ref = critic_ref(state, action, params)
    assert q.shape == (batch, 1), q.shape
    if compute_dtype == jnp.bfloat16:
        atol = rtol = 5e-2     # bf16 weight quantization vs. f32 reference
    else:
        atol = rtol = 1e-4
    assert jnp.allclose(q, q_ref, atol=atol, rtol=rtol), (q, q_ref)

    print("KERNEL_OK")
</pallas_src>

<mosaic_0001>
module attributes {stable_mosaic.version = 11 : i64} {
  func.func @_critic_kernel(%arg0: i32, %arg1: memref<8x17xf32, #tpu.memory_space<vmem>>, %arg2: memref<8x6xf32, #tpu.memory_space<vmem>>, %arg3: memref<17x512xbf16, #tpu.memory_space<vmem>>, %arg4: memref<6x512xbf16, #tpu.memory_space<vmem>>, %arg5: memref<1x512xf32, #tpu.memory_space<vmem>>, %arg6: memref<512x384xbf16, #tpu.memory_space<vmem>>, %arg7: memref<1x384xf32, #tpu.memory_space<vmem>>, %arg8: memref<1x384xf32, #tpu.memory_space<vmem>>, %arg9: memref<1x1xf32, #tpu.memory_space<vmem>>, %arg10: memref<8x1xf32, #tpu.memory_space<vmem>>) attributes {dimension_semantics = [#tpu.dimension_semantics<parallel>], iteration_bounds = array<i64: 1>, scalar_prefetch = 0 : i64, scratch_operands = 0 : i64, tpu.core_type = #tpu.core_type<tc>, window_params = [{transform_indices = @transform_0, window_bounds = array<i64: 8, 17>}, {transform_indices = @transform_1, window_bounds = array<i64: 8, 6>}, {pipeline_mode = #tpu.pipeline_mode<synchronous>, transform_indices = @transform_2, window_bounds = array<i64: 17, 512>}, {pipeline_mode = #tpu.pipeline_mode<synchronous>, transform_indices = @transform_3, window_bounds = array<i64: 6, 512>}, {pipeline_mode = #tpu.pipeline_mode<synchronous>, transform_indices = @transform_4, window_bounds = array<i64: 1, 512>}, {pipeline_mode = #tpu.pipeline_mode<synchronous>, transform_indices = @transform_5, window_bounds = array<i64: 512, 384>}, {pipeline_mode = #tpu.pipeline_mode<synchronous>, transform_indices = @transform_6, window_bounds = array<i64: 1, 384>}, {pipeline_mode = #tpu.pipeline_mode<synchronous>, transform_indices = @transform_7, window_bounds = array<i64: 1, 384>}, {pipeline_mode = #tpu.pipeline_mode<synchronous>, transform_indices = @transform_8, window_bounds = array<i64: 1, 1>}, {transform_indices = @transform_9, window_bounds = array<i64: 8, 1>}]} {
    %c0 = arith.constant 0 : index
    %c0_0 = arith.constant 0 : index
    %0 = vector.load %arg1[%c0, %c0_0] : memref<8x17xf32, #tpu.memory_space<vmem>>, vector<8x17xf32>
    %1 = arith.truncf %0 : vector<8x17xf32> to vector<8x17xbf16>
    %c0_1 = arith.constant 0 : index
    %c0_2 = arith.constant 0 : index
    %2 = vector.load %arg2[%c0_1, %c0_2] : memref<8x6xf32, #tpu.memory_space<vmem>>, vector<8x6xf32>
    %3 = arith.truncf %2 : vector<8x6xf32> to vector<8x6xbf16>
    %c0_3 = arith.constant 0 : index
    %c0_4 = arith.constant 0 : index
    %4 = vector.load %arg3[%c0_3, %c0_4] : memref<17x512xbf16, #tpu.memory_space<vmem>>, vector<17x512xbf16>
    %cst = arith.constant dense<0.000000e+00> : vector<8x512xf32>
    %5 = tpu.matmul %1, %4, %cst {dimension_numbers = #tpu.dot_dimension_numbers<[1], [0], [0], [1], [0, 0, 1, 1], [], []>} : vector<8x17xbf16>, vector<17x512xbf16>, vector<8x512xf32> -> vector<8x512xf32>
    %c0_5 = arith.constant 0 : index
    %c0_6 = arith.constant 0 : index
    %6 = vector.load %arg4[%c0_5, %c0_6] : memref<6x512xbf16, #tpu.memory_space<vmem>>, vector<6x512xbf16>
    %cst_7 = arith.constant dense<0.000000e+00> : vector<8x512xf32>
    %7 = tpu.matmul %3, %6, %cst_7 {dimension_numbers = #tpu.dot_dimension_numbers<[1], [0], [0], [1], [0, 0, 1, 1], [], []>} : vector<8x6xbf16>, vector<6x512xbf16>, vector<8x512xf32> -> vector<8x512xf32>
    %8 = arith.addf %5, %7 : vector<8x512xf32>
    %c0_8 = arith.constant 0 : index
    %c0_9 = arith.constant 0 : index
    %9 = vector.load %arg5[%c0_8, %c0_9] : memref<1x512xf32, #tpu.memory_space<vmem>>, vector<1x512xf32>
    %10 = vector.broadcast %9 : vector<1x512xf32> to vector<8x512xf32>
    %11 = arith.addf %8, %10 : vector<8x512xf32>
    %cst_10 = arith.constant 0.000000e+00 : f32
    %12 = vector.broadcast %cst_10 : f32 to vector<8x512xf32>
    %13 = arith.maximumf %11, %12 : vector<8x512xf32>
    %14 = arith.truncf %13 : vector<8x512xf32> to vector<8x512xbf16>
    %c0_11 = arith.constant 0 : index
    %c0_12 = arith.constant 0 : index
    %15 = vector.load %arg6[%c0_11, %c0_12] : memref<512x384xbf16, #tpu.memory_space<vmem>>, vector<512x384xbf16>
    %cst_13 = arith.constant dense<0.000000e+00> : vector<8x384xf32>
    %16 = tpu.matmul %14, %15, %cst_13 {dimension_numbers = #tpu.dot_dimension_numbers<[1], [0], [0], [1], [0, 0, 1, 1], [], []>} : vector<8x512xbf16>, vector<512x384xbf16>, vector<8x384xf32> -> vector<8x384xf32>
    %c0_14 = arith.constant 0 : index
    %c0_15 = arith.constant 0 : index
    %17 = vector.load %arg7[%c0_14, %c0_15] : memref<1x384xf32, #tpu.memory_space<vmem>>, vector<1x384xf32>
    %18 = vector.broadcast %17 : vector<1x384xf32> to vector<8x384xf32>
    %19 = arith.addf %16, %18 : vector<8x384xf32>
    %cst_16 = arith.constant 0.000000e+00 : f32
    %20 = vector.broadcast %cst_16 : f32 to vector<8x384xf32>
    %21 = arith.maximumf %19, %20 : vector<8x384xf32>
    %c0_17 = arith.constant 0 : index
    %c0_18 = arith.constant 0 : index
    %22 = vector.load %arg8[%c0_17, %c0_18] : memref<1x384xf32, #tpu.memory_space<vmem>>, vector<1x384xf32>
    %23 = vector.broadcast %22 : vector<1x384xf32> to vector<8x384xf32>
    %24 = arith.mulf %21, %23 : vector<8x384xf32>
    %cst_19 = arith.constant dense<0.000000e+00> : vector<8xf32>
    %25 = vector.multi_reduction <add>, %24, %cst_19 [1] : vector<8x384xf32> to vector<8xf32>
    %26 = vector.shape_cast %25 : vector<8xf32> to vector<8x1xf32>
    %c0_20 = arith.constant 0 : index
    %c0_21 = arith.constant 0 : index
    %27 = vector.load %arg9[%c0_20, %c0_21] : memref<1x1xf32, #tpu.memory_space<vmem>>, vector<1x1xf32>
    %28 = vector.broadcast %27 : vector<1x1xf32> to vector<8x1xf32>
    %29 = arith.addf %26, %28 : vector<8x1xf32>
    %c0_22 = arith.constant 0 : index
    %c0_23 = arith.constant 0 : index
    %30 = vector.load %arg10[%c0_22, %c0_23] : memref<8x1xf32, #tpu.memory_space<vmem>>, vector<8x1xf32>
    tpu.vector_store %arg10[%c0_22, %c0_23], %29 {strides = array<i32>} : memref<8x1xf32, #tpu.memory_space<vmem>>, vector<8x1xf32>,
    return
  }
  func.func @transform_0(%arg0: i32) -> (i32, i32) {
    %c0_i32 = arith.constant 0 : i32
    %c0_i32_0 = arith.constant 0 : i32
    return %arg0, %c0_i32 : i32, i32
  }
  func.func @transform_1(%arg0: i32) -> (i32, i32) {
    %c0_i32 = arith.constant 0 : i32
    %c0_i32_0 = arith.constant 0 : i32
    return %arg0, %c0_i32 : i32, i32
  }
  func.func @transform_2(%arg0: i32) -> (i32, i32) {
    %c0_i32 = arith.constant 0 : i32
    %c0_i32_0 = arith.constant 0 : i32
    %c0_i32_1 = arith.constant 0 : i32
    return %c0_i32, %c0_i32_0 : i32, i32
  }
  func.func @transform_3(%arg0: i32) -> (i32, i32) {
    %c0_i32 = arith.constant 0 : i32
    %c0_i32_0 = arith.constant 0 : i32
    %c0_i32_1 = arith.constant 0 : i32
    return %c0_i32, %c0_i32_0 : i32, i32
  }
  func.func @transform_4(%arg0: i32) -> (i32, i32) {
    %c0_i32 = arith.constant 0 : i32
    %c0_i32_0 = arith.constant 0 : i32
    %c0_i32_1 = arith.constant 0 : i32
    return %c0_i32, %c0_i32_0 : i32, i32
  }
  func.func @transform_5(%arg0: i32) -> (i32, i32) {
    %c0_i32 = arith.constant 0 : i32
    %c0_i32_0 = arith.constant 0 : i32
    %c0_i32_1 = arith.constant 0 : i32
    return %c0_i32, %c0_i32_0 : i32, i32
  }
  func.func @transform_6(%arg0: i32) -> (i32, i32) {
    %c0_i32 = arith.constant 0 : i32
    %c0_i32_0 = arith.constant 0 : i32
    %c0_i32_1 = arith.constant 0 : i32
    return %c0_i32, %c0_i32_0 : i32, i32
  }
  func.func @transform_7(%arg0: i32) -> (i32, i32) {
    %c0_i32 = arith.constant 0 : i32
    %c0_i32_0 = arith.constant 0 : i32
    %c0_i32_1 = arith.constant 0 : i32
    return %c0_i32, %c0_i32_0 : i32, i32
  }
  func.func @transform_8(%arg0: i32) -> (i32, i32) {
    %c0_i32 = arith.constant 0 : i32
    %c0_i32_0 = arith.constant 0 : i32
    %c0_i32_1 = arith.constant 0 : i32
    return %c0_i32, %c0_i32_0 : i32, i32
  }
  func.func @transform_9(%arg0: i32) -> (i32, i32) {
    %c0_i32 = arith.constant 0 : i32
    %c0_i32_0 = arith.constant 0 : i32
    return %arg0, %c0_i32 : i32, i32
  }
}

</mosaic_0001>

<bundles_post_ra>
// kernel: tpu_custom_call.1
= control target key start
LH: loop header
LB: loop body
LE: loop exit
PB: predicated region body
PF: predicated region fallthrough
CT: control target
= control target key end

     0   :  { %s1967_s0 = inlined_call_operand.hbm [shape: f32[8,17], index: 0, kind: input, shape index: {}]   ;;  %s1968_s1 = inlined_call_operand.hbm [shape: f32[8,6], index: 1, kind: input, shape index: {}]   ;;  %s1969_s2 = inlined_call_operand.hbm [shape: bf16[17,512], index: 2, kind: input, shape index: {}]   ;;  %s1970_s3 = inlined_call_operand.hbm [shape: bf16[6,512], index: 3, kind: input, shape index: {}]   ;;  %s1971_s4 = inlined_call_operand.vmem [shape: f32[1,512], index: 4, kind: input, shape index: {}]   ;;  %s1972_s5 = inlined_call_operand.hbm [shape: bf16[512,384], index: 5, kind: input, shape index: {}]   ;;  %s1973_s6 = inlined_call_operand.vmem [shape: f32[1,384], index: 6, kind: input, shape index: {}]   ;;  %s1974_s7 = inlined_call_operand.hbm [shape: f32[1,384], index: 7, kind: input, shape index: {}]   ;;  %s1975_s8 = inlined_call_operand.<no memory space> [shape: f32[1,1], index: 8, kind: input, shape index: {}]   ;;  %s1976_s9 = inlined_call_operand.vmem [shape: f32[8,1], index: 9, kind: output, shape index: {}]  }
   0x1   :  { %v14_v0 = vstv %s1975_s8 }
   0x2   :  { %15 = vst [vmem:[#allocation2] sm:$0x1] %v14_v0 }
   0x3   :  { %16 = vsyncpa [#allocation4], 0 }
   0x4   :  { %17 = vsyncpa [#allocation6], 0 }
   0x5   :  { %18 = vsyncpa [#allocation9], 0  ;;  %s36_s13 = sshll.u32 %s1968_s1, 4  ;;  %s37_s13 = int_to_ptr.hbm [resolvable:$true] %s36_s13 }
   0x6   :  { %19 = vsyncpa [#allocation12], 0  ;;  %s1844_s14 = smov [#allocation5]   ;;  %s60_s18 = sshll.u32 %s1970_s3, 4  ;;  %s61_s18 = int_to_ptr.hbm [resolvable:$true] %s60_s18 }
   0x7   :  { %s38_s15 = sshll.u32 %s1844_s14, 4  ;;  %s1845_s8 = smov [#allocation8]   ;;  %s39_s15 = int_to_ptr.vmem [resolvable:$true] %s38_s15 }
   0x8   :  { %41 = dma.hbm_to_vmem [thread:$0]  %s37_s13, 128, %s39_s15, [#allocation6]  }
   0x9   :  { %s62_s19 = sshll.u32 %s1845_s8, 4  ;;  %s25_s22 = sshll.u32 %s1967_s0, 4  ;;  %s63_s19 = int_to_ptr.vmem [resolvable:$true] %s62_s19  ;;  %s26_s22 = int_to_ptr.hbm [resolvable:$true] %s25_s22 }
   0xa   :  { %65 = dma.hbm_to_vmem [thread:$0]  %s61_s18, 256, %s63_s19, [#allocation9]  }
   0xb   :  { %s46_s24 = sshll.u32 %s1969_s2, 4  ;;  %s1846_s25 = smov [#allocation3]   ;;  %s47_s24 = int_to_ptr.hbm [resolvable:$true] %s46_s24 }
   0xc   :  { %s27_s26 = sshll.u32 %s1846_s25, 4  ;;  %s1847_s3 = smov [#allocation7]   ;;  %s28_s26 = int_to_ptr.vmem [resolvable:$true] %s27_s26 }
   0xd   :  { %30 = dma.hbm_to_vmem [thread:$0]  %s26_s22, 128, %s28_s26, [#allocation4]  }
   0xe   :  { %s48_s27 = sshll.u32 %s1847_s3, 4  ;;  %s1848_s28 = smov 256   ;;  %s49_s27 = int_to_ptr.vmem [resolvable:$true] %s48_s27 }
   0xf   :  { %s1849_s29 = smov 16   ;;  %s72_s10 = sshll.u32 %s1972_s5, 4  ;;  %s73_s10 = int_to_ptr.hbm [resolvable:$true] %s72_s10 }
  0x10   :  { %54 = dma.hbm_to_vmem [thread:$0]  %s47_s24, 768, %s49_s27, [#allocation6], %s1848_s28, %s1848_s28, %s1849_s29  }
  0x11   :  { %s1850_s11 = smov [#allocation10]   ;;  %s88_s14 = sshll.u32 %s1974_s7, 4  ;;  %s89_s14 = int_to_ptr.hbm [resolvable:$true] %s88_s14 }
  0x12   :  { %s74_s12 = sshll.u32 %s1850_s11, 4  ;;  %s1851_s15 = smov 192   ;;  %s75_s12 = int_to_ptr.vmem [resolvable:$true] %s74_s12 }
  0x13   :  { %s1852_s16 = smov 12   ;;  %s1853_s17 = smov [#allocation11]  }
  0x14   :  { %80 = dma.hbm_to_vmem [thread:$0]  %s73_s10, 12288, %s75_s12, [#allocation9], %s1851_s15, %s1851_s15, %s1852_s16  }
  0x15   :  { %s90_s18 = sshll.u32 %s1853_s17, 4  ;;  %s91_s18 = int_to_ptr.vmem [resolvable:$true] %s90_s18 }
  0x16   :  { %93 = dma.hbm_to_vmem [thread:$0]  %s89_s14, 48, %s91_s18, [#allocation12]  }
  0x17   :  { %1836 = dma.done.wait [#allocation4], 128  }
  0x18   :  { %1837 = vsyncadd [#allocation4], 4294967168 }
  0x19   :  { %1838 = dma.done.wait [#allocation6], 896  }
  0x1a   :  { %1839 = vsyncadd [#allocation6], 4294966400 }
  0x1b   :  { %1840 = dma.done.wait [#allocation9], 12544  }
  0x1c   :  { %1841 = vsyncadd [#allocation9], 4294954752 }
  0x1d   :  { %1842 = dma.done.wait [#allocation12], 48  }
  0x1e   :  { %1843 = vsyncadd [#allocation12], 4294967248  ;;  %vm246_vm0 = vcmask 1040384   ;;  %v131_v1 = vld [vmem:[#allocation8] sm:$0x77]  ;;  %vm147_vm1 = vcmask 1042432  }
  0x1f   :  { %v132_v2 = vld [vmem:[#allocation8 + $0x8] sm:$0x77]  ;;  %vm143_vm2 = vcmask 48128   ;;  %v135_v3 = vunpack.c.l.b16 %v131_v1  ;;  %v136_v4 = vunpack.c.h.b16 %v131_v1  ;;  %v130_v8 = vld [vmem:[#allocation7 + $0x28] sm:$0x11]  ;;  %v1854_v11 = vmov 0  }
  0x20   :  { %v137_v5 = vunpack.c.l.b16 %v132_v2  ;;  %v138_v6 = vunpack.c.h.b16 %v132_v2  ;;  %v123_v7 = vld [vmem:[#allocation5] sm:$0xff]  ;;  %v129_v9 = vld [vmem:[#allocation7 + $0x20] sm:$0x11]  ;;  %v228_v10 = vunpack.c.l.b16 %v130_v8  ;;  %v248_v12 = vsel %vm246_vm0, 65535, %v1854_v11  ;;  %v1186_v23 = vld [vmem:[#allocation7 + $0x8] sm:$0xf] }
  0x21   :  { %v229_v13 = vunpack.c.h.b16 %v130_v8  ;;  %v226_v14 = vunpack.c.l.b16 %v129_v9  ;;  %v139_v15 = vpack.c.b16 %v135_v3, %v135_v3  ;;  %v140_v16 = vpack.c.b16 %v136_v4, %v136_v4  ;;  %v1583_v28 = vld [vmem:[#allocation7 + $0x14] sm:$0xf0]  ;;  %v1581_v32 = vld [vmem:[#allocation7 + $0xc] sm:$0xf]  ;;  %v1188_v33 = vld [vmem:[#allocation7 + $0x18] sm:$0xf0] }
  0x22   :  { %v141_v17 = vpack.c.b16 %v137_v5, %v137_v5  ;;  %v142_v18 = vpack.c.b16 %v138_v6, %v138_v6  ;;  %v124_v19 = vpack.c.bf16 %v123_v7, %v123_v7  ;;  %v236_v20 = vpack.c.b16 %v228_v10, %v228_v10  ;;  %v1178_v34 = vld [vmem:[#allocation7] sm:$0xf]  ;;  %v1582_v36 = vld [vmem:[#allocation7 + $0xc] sm:$0xf0]  ;;  %v1580_v37 = vld [vmem:[#allocation7 + $0x4] sm:$0xf] }
  0x23   :  { %v237_v21 = vpack.c.b16 %v229_v13, %v229_v13  ;;  %v234_v22 = vpack.c.b16 %v226_v14, %v226_v14  ;;  %v149_v24 = vsel %vm147_vm1, %v139_v15, 0  ;;  %v152_v25 = vsel %vm147_vm1, %v140_v16, 0  ;;  %v1180_v38 = vld [vmem:[#allocation7 + $0x10] sm:$0xf0]  ;;  %v1474_v41 = vld [vmem:[#allocation10 + $0x228] sm:$0xf] }
  0x24   :  { %v155_v26 = vsel %vm147_vm1, %v141_v17, 0  ;;  %v158_v27 = vsel %vm147_vm1, %v142_v18, 0  ;;  %167 = vmatpush.bf16.msra.mxu0 %v149_v24  ;;  %180 = vmatpush.bf16.msra.mxu1 %v152_v25  ;;  %v256_v29 = vand.u32 %v248_v12, %v236_v20  ;;  %v227_v31 = vunpack.c.h.b16 %v129_v9  ;;  %v1654_v42 = vld [vmem:[#allocation10 + $0x230] sm:$0xf0]  ;;  %v1570_v43 = vld [vmem:[#allocation10 + $0x2e8] sm:$0xf] }
  0x25   :  { %v259_v30 = vand.u32 %v248_v12, %v237_v21  ;;  %193 = vmatpush.bf16.msra.mxu2 %v155_v26  ;;  %206 = vmatpush.bf16.msra.mxu3 %v158_v27  ;;  %v250_v35 = vand.u32 %v248_v12, %v234_v22  ;;  %v1187_v39 = vor.u32 %v1583_v28, %v1186_v23  ;;  %v1282_v45 = vld [vmem:[#allocation10 + $0xa8] sm:$0xf]  ;;  %v1606_v46 = vld [vmem:[#allocation10 + $0xb0] sm:$0xf0]  ;;  %v1462_v53 = vld [vmem:[#allocation10 + $0x210] sm:$0xf] }
  0x26   :  { %v235_v40 = vpack.c.b16 %v227_v31, %v227_v31  ;;  %v1191_v44 = vor.u32 %v1581_v32, %v1188_v33  ;;  %v1678_v47 = vld [vmem:[#allocation10 + $0x2f0] sm:$0xf0]  ;;  %v1378_v49 = vld [vmem:[#allocation10 + $0x168] sm:$0xf]  ;;  %v1475_v51 = vor.u32 %v1654_v42, %v1474_v41  ;;  %v1179_v54 = vor.u32 %v1582_v36, %v1178_v34  ;;  %v1651_v55 = vld [vmem:[#allocation10 + $0x218] sm:$0xf0] }
  0x27   :  { %1172 = vmatmul.msk.bf16.vlgmr.msra.gmra.mxu0 %vm143_vm2, %v124_v19  ;;  %1173 = vmatmul.msk.bf16.vlgmr.msra.gmra.mxu1 %vm143_vm2, %v124_v19  ;;  %v1630_v50 = vld [vmem:[#allocation10 + $0x170] sm:$0xf0]  ;;  %v1571_v52 = vor.u32 %v1678_v47, %v1570_v43  ;;  %v1558_v56 = vld [vmem:[#allocation10 + $0x2d0] sm:$0xf]  ;;  %v1675_v57 = vld [vmem:[#allocation10 + $0x2d8] sm:$0xf0]  ;;  %v1183_v58 = vor.u32 %v1580_v37, %v1180_v38  ;;  %v1283_v59 = vor.u32 %v1606_v46, %v1282_v45 }
  0x28   :  { %1174 = vmatmul.msk.bf16.vlgmr.msra.gmra.mxu2 %vm143_vm2, %v124_v19  ;;  %1175 = vmatmul.msk.bf16.vlgmr.msra.gmra.mxu3 %vm143_vm2, %v124_v19  ;;  %v253_v48 = vand.u32 %v248_v12, %v235_v40  ;;  %v1379_v60 = vor.u32 %v1630_v50, %v1378_v49  ;;  %v1270_v61 = vld [vmem:[#allocation10 + $0x90] sm:$0xf]  ;;  %v1603_v62 = vld [vmem:[#allocation10 + $0x98] sm:$0xf0]  ;;  %v1463_v0 = vor.u32 %v1651_v55, %v1462_v53  ;;  %v1450_v3 = vld [vmem:[#allocation10 + $0x1f8] sm:$0xf] }
  0x29   :  { %293 = vmatpush.bf16.msrb.mxu2 %v256_v29  ;;  %306 = vmatpush.bf16.msrb.mxu3 %v259_v30  ;;  %v1366_v63 = vld [vmem:[#allocation10 + $0x150] sm:$0xf]  ;;  %v1627_v1 = vld [vmem:[#allocation10 + $0x158] sm:$0xf0]  ;;  %v1559_v2 = vor.u32 %v1675_v57, %v1558_v56  ;;  %v1648_v4 = vld [vmem:[#allocation10 + $0x200] sm:$0xf0]  ;;  %v1271_v7 = vor.u32 %v1603_v62, %v1270_v61 }
  0x2a   :  { %267 = vmatpush.bf16.msrb.mxu0 %v250_v35  ;;  %280 = vmatpush.bf16.msrb.mxu1 %v253_v48  ;;  %v1546_v5 = vld [vmem:[#allocation10 + $0x2b8] sm:$0xf]  ;;  %v1672_v6 = vld [vmem:[#allocation10 + $0x2c0] sm:$0xf0]  ;;  %v1367_v8 = vor.u32 %v1627_v1, %v1366_v63  ;;  %v1451_v11 = vor.u32 %v1648_v4, %v1450_v3  ;;  %v121_v12 = vld [vmem:[#allocation3] sm:$0xff]  ;;  %vm242_vm3 = vcmask 138240  }
  0x2b   :  { %v1258_v9 = vld [vmem:[#allocation10 + $0x78] sm:$0xf]  ;;  %v1600_v10 = vld [vmem:[#allocation10 + $0x80] sm:$0xf0]  ;;  %v1547_v13 = vor.u32 %v1672_v6, %v1546_v5  ;;  %v1246_v17 = vld [vmem:[#allocation10 + $0x60] sm:$0xf]  ;;  %v122_v20 = vpack.c.bf16 %v121_v12, %v121_v12 }
  0x2c   :  { %v1354_v14 = vld [vmem:[#allocation10 + $0x138] sm:$0xf]  ;;  %v1624_v15 = vld [vmem:[#allocation10 + $0x140] sm:$0xf0]  ;;  %v1259_v16 = vor.u32 %v1600_v10, %v1258_v9  ;;  %v1438_v18 = vld [vmem:[#allocation10 + $0x1e0] sm:$0xf] }
  0x2d   :  { %294 = vmatpush.bf16.msrb.mxu2 %v1187_v39  ;;  %307 = vmatpush.bf16.msrb.mxu3 %v1191_v44  ;;  %v1645_v19 = vld [vmem:[#allocation10 + $0x1e8] sm:$0xf0]  ;;  %v1534_v22 = vld [vmem:[#allocation10 + $0x2a0] sm:$0xf]  ;;  %v1355_v24 = vor.u32 %v1624_v15, %v1354_v14  ;;  %v1234_v29 = vld [vmem:[#allocation10 + $0x48] sm:$0xf] }
  0x2e   :  { %268 = vmatpush.bf16.msrb.mxu0 %v1179_v54  ;;  %281 = vmatpush.bf16.msrb.mxu1 %v1183_v58  ;;  %v1597_v21 = vld [vmem:[#allocation10 + $0x68] sm:$0xf0]  ;;  %v1342_v25 = vld [vmem:[#allocation10 + $0x120] sm:$0xf]  ;;  %v1439_v27 = vor.u32 %v1645_v19, %v1438_v18  ;;  %v1426_v31 = vld [vmem:[#allocation10 + $0x1c8] sm:$0xf] }
  0x2f   :  { %v1669_v23 = vld [vmem:[#allocation10 + $0x2a8] sm:$0xf0]  ;;  %v1247_v28 = vor.u32 %v1597_v21, %v1246_v17  ;;  %v1642_v32 = vld [vmem:[#allocation10 + $0x1d0] sm:$0xf0]  ;;  %v1522_v34 = vld [vmem:[#allocation10 + $0x288] sm:$0xf] }
  0x30   :  { %v1621_v26 = vld [vmem:[#allocation10 + $0x128] sm:$0xf0]  ;;  %v1535_v30 = vor.u32 %v1669_v23, %v1534_v22  ;;  %v1594_v33 = vld [vmem:[#allocation10 + $0x50] sm:$0xf0]  ;;  %v1330_v37 = vld [vmem:[#allocation10 + $0x108] sm:$0xf]  ;;  %v1427_v39 = vor.u32 %v1642_v32, %v1426_v31 }
  0x31   :  { %1009 = vmatpush.bf16.msra.mxu2 %v1475_v51  ;;  %1022 = vmatpush.bf16.msra.mxu3 %v1571_v52  ;;  %v1666_v35 = vld [vmem:[#allocation10 + $0x290] sm:$0xf0]  ;;  %v1343_v36 = vor.u32 %v1621_v26, %v1342_v25  ;;  %v1235_v40 = vor.u32 %v1594_v33, %v1234_v29  ;;  %v1222_v41 = vld [vmem:[#allocation10 + $0x30] sm:$0xf]  ;;  %v1639_v44 = vld [vmem:[#allocation10 + $0x1b8] sm:$0xf0] }
  0x32   :  { %983 = vmatpush.bf16.msra.mxu0 %v1283_v59  ;;  %996 = vmatpush.bf16.msra.mxu1 %v1379_v60  ;;  %v1618_v38 = vld [vmem:[#allocation10 + $0x110] sm:$0xf0]  ;;  %v1523_v42 = vor.u32 %v1666_v35, %v1522_v34  ;;  %v1414_v43 = vld [vmem:[#allocation10 + $0x1b0] sm:$0xf]  ;;  %v1591_v45 = vld [vmem:[#allocation10 + $0x38] sm:$0xf0] }
  0x33   :  { %v1510_v46 = vld [vmem:[#allocation10 + $0x270] sm:$0xf]  ;;  %v1663_v47 = vld [vmem:[#allocation10 + $0x278] sm:$0xf0]  ;;  %v1331_v48 = vor.u32 %v1618_v38, %v1330_v37  ;;  %v1415_v51 = vor.u32 %v1639_v44, %v1414_v43  ;;  %v1223_v52 = vor.u32 %v1591_v45, %v1222_v41  ;;  %v1210_v53 = vld [vmem:[#allocation10 + $0x18] sm:$0xf] }
  0x34   :  { %v1318_v49 = vld [vmem:[#allocation10 + $0xf0] sm:$0xf]  ;;  %v1615_v50 = vld [vmem:[#allocation10 + $0xf8] sm:$0xf0]  ;;  %v1511_v54 = vor.u32 %v1663_v47, %v1510_v46  ;;  %v1402_v55 = vld [vmem:[#allocation10 + $0x198] sm:$0xf] }
  0x35   :  { %1010 = vmatpush.bf16.msra.mxu2 %v1463_v0  ;;  %1023 = vmatpush.bf16.msra.mxu3 %v1559_v2  ;;  %v1636_v56 = vld [vmem:[#allocation10 + $0x1a0] sm:$0xf0]  ;;  %v1498_v58 = vld [vmem:[#allocation10 + $0x258] sm:$0xf]  ;;  %v1319_v60 = vor.u32 %v1615_v50, %v1318_v49  ;;  %v1198_v2 = vld [vmem:[#allocation10] sm:$0xf] }
  0x36   :  { %984 = vmatpush.bf16.msra.mxu0 %v1271_v7  ;;  %997 = vmatpush.bf16.msra.mxu1 %v1367_v8  ;;  %v1588_v57 = vld [vmem:[#allocation10 + $0x20] sm:$0xf0]  ;;  %v1403_v61 = vor.u32 %v1636_v56, %v1402_v55  ;;  %v1306_v63 = vld [vmem:[#allocation10 + $0xd8] sm:$0xf]  ;;  %v1585_v3 = vld [vmem:[#allocation10 + $0x8] sm:$0xf0] }
  0x37   :  { %1192 = vmatmul.msk.bf16.vlgmr.msrb.gmra.mxu0 %vm242_vm3, %v122_v20  ;;  %1193 = vmatmul.msk.bf16.vlgmr.msrb.gmra.mxu1 %vm242_vm3, %v122_v20  ;;  %v1660_v59 = vld [vmem:[#allocation10 + $0x260] sm:$0xf0]  ;;  %v1211_v62 = vor.u32 %v1588_v57, %v1210_v53  ;;  %v1605_v4 = vld [vmem:[#allocation10 + $0xac] sm:$0xf]  ;;  %v1284_v5 = vld [vmem:[#allocation10 + $0xb4] sm:$0xf0]  ;;  %v1199_v7 = vor.u32 %v1585_v3, %v1198_v2 }
  0x38   :  { %1194 = vmatmul.msk.bf16.vlgmr.msrb.gmra.mxu2 %vm242_vm3, %v122_v20  ;;  %1195 = vmatmul.msk.bf16.vlgmr.msrb.gmra.mxu3 %vm242_vm3, %v122_v20  ;;  %v1612_v0 = vld [vmem:[#allocation10 + $0xe0] sm:$0xf0]  ;;  %v1499_v1 = vor.u32 %v1660_v59, %v1498_v58  ;;  %v1294_v8 = vld [vmem:[#allocation10 + $0xc0] sm:$0xf]  ;;  %v1609_v9 = vld [vmem:[#allocation10 + $0xc8] sm:$0xf0]  ;;  %v1287_v10 = vor.u32 %v1605_v4, %v1284_v5 }
  0x39   :  { %1011 = vmatpush.bf16.msra.mxu2 %v1451_v11  ;;  %1024 = vmatpush.bf16.msra.mxu3 %v1547_v13  ;;  %v1307_v6 = vor.u32 %v1612_v0, %v1306_v63  ;;  %v1629_v11 = vld [vmem:[#allocation10 + $0x16c] sm:$0xf]  ;;  %v1380_v12 = vld [vmem:[#allocation10 + $0x174] sm:$0xf0]  ;;  %v1295_v13 = vor.u32 %v1609_v9, %v1294_v8  ;;  %v1602_v15 = vld [vmem:[#allocation10 + $0x94] sm:$0xf] }
  0x3a   :  { %985 = vmatpush.bf16.msra.mxu0 %v1259_v16  ;;  %998 = vmatpush.bf16.msra.mxu1 %v1355_v24  ;;  %v1383_v14 = vor.u32 %v1629_v11, %v1380_v12  ;;  %v1272_v16 = vld [vmem:[#allocation10 + $0x9c] sm:$0xf0]  ;;  %v1626_v17 = vld [vmem:[#allocation10 + $0x154] sm:$0xf]  ;;  %v1633_v21 = vld [vmem:[#allocation10 + $0x188] sm:$0xf0] }
  0x3b   :  { %v1275_v18 = vor.u32 %v1602_v15, %v1272_v16  ;;  %v1368_v19 = vld [vmem:[#allocation10 + $0x15c] sm:$0xf0]  ;;  %v1657_v25 = vld [vmem:[#allocation10 + $0x248] sm:$0xf0]  ;;  %v1599_v33 = vld [vmem:[#allocation10 + $0x7c] sm:$0xf] }
  0x3c   :  { %v1390_v20 = vld [vmem:[#allocation10 + $0x180] sm:$0xf]  ;;  %v1371_v22 = vor.u32 %v1626_v17, %v1368_v19  ;;  %v1653_v26 = vld [vmem:[#allocation10 + $0x22c] sm:$0xf]  ;;  %v1260_v34 = vld [vmem:[#allocation10 + $0x84] sm:$0xf0] }
  0x3d   :  { %1012 = vmatpush.bf16.msra.mxu2 %v1439_v27  ;;  %1025 = vmatpush.bf16.msra.mxu3 %v1535_v30  ;;  %v1391_v23 = vor.u32 %v1633_v21, %v1390_v20  ;;  %v1486_v24 = vld [vmem:[#allocation10 + $0x240] sm:$0xf]  ;;  %v1677_v29 = vld [vmem:[#allocation10 + $0x2ec] sm:$0xf]  ;;  %v1572_v30 = vld [vmem:[#allocation10 + $0x2f4] sm:$0xf0] }
  0x3e   :  { %986 = vmatpush.bf16.msra.mxu0 %v1247_v28  ;;  %999 = vmatpush.bf16.msra.mxu1 %v1343_v36  ;;  %v1487_v27 = vor.u32 %v1657_v25, %v1486_v24  ;;  %v1476_v28 = vld [vmem:[#allocation10 + $0x234] sm:$0xf0]  ;;  %v1575_v32 = vor.u32 %v1677_v29, %v1572_v30  ;;  %v1623_v35 = vld [vmem:[#allocation10 + $0x13c] sm:$0xf]  ;;  %v1263_v36 = vor.u32 %v1599_v33, %v1260_v34  ;;  %v1356_v37 = vld [vmem:[#allocation10 + $0x144] sm:$0xf0] }
  0x3f   :  { %v1479_v31 = vor.u32 %v1653_v26, %v1476_v28  ;;  %v1359_v38 = vor.u32 %v1623_v35, %v1356_v37  ;;  %v1674_v41 = vld [vmem:[#allocation10 + $0x2d4] sm:$0xf]  ;;  %v1560_v43 = vld [vmem:[#allocation10 + $0x2dc] sm:$0xf0]  ;;  %v1596_v45 = vld [vmem:[#allocation10 + $0x64] sm:$0xf] }
  0x40   :  { %v1563_v44 = vor.u32 %v1674_v41, %v1560_v43  ;;  %v1248_v46 = vld [vmem:[#allocation10 + $0x6c] sm:$0xf0]  ;;  %v1620_v47 = vld [vmem:[#allocation10 + $0x124] sm:$0xf]  ;;  %v1647_v50 = vld [vmem:[#allocation10 + $0x1fc] sm:$0xf] }
  0x41   :  { %1013 = vmatpush.bf16.msra.mxu2 %v1427_v39  ;;  %1026 = vmatpush.bf16.msra.mxu3 %v1523_v42  ;;  %v1650_v39 = vld [vmem:[#allocation10 + $0x214] sm:$0xf]  ;;  %v1344_v49 = vld [vmem:[#allocation10 + $0x12c] sm:$0xf0]  ;;  %v1548_v55 = vld [vmem:[#allocation10 + $0x2c4] sm:$0xf0] }
  0x42   :  { %987 = vmatpush.bf16.msra.mxu0 %v1235_v40  ;;  %1000 = vmatpush.bf16.msra.mxu1 %v1331_v48  ;;  %v1464_v40 = vld [vmem:[#allocation10 + $0x21c] sm:$0xf0]  ;;  %v1251_v48 = vor.u32 %v1596_v45, %v1248_v46  ;;  %v1593_v56 = vld [vmem:[#allocation10 + $0x4c] sm:$0xf]  ;;  %v1236_v58 = vld [vmem:[#allocation10 + $0x54] sm:$0xf0] }
  0x43   :  { %v1467_v42 = vor.u32 %v1650_v39, %v1464_v40  ;;  %v1617_v59 = vld [vmem:[#allocation10 + $0x10c] sm:$0xf]  ;;  %v1644_v63 = vld [vmem:[#allocation10 + $0x1e4] sm:$0xf]  ;;  %v1440_v0 = vld [vmem:[#allocation10 + $0x1ec] sm:$0xf0] }
  0x44   :  { %v1443_v2 = vor.u32 %v1644_v63, %v1440_v0  ;;  %v1536_v3 = vld [vmem:[#allocation10 + $0x2ac] sm:$0xf0]  ;;  %v1590_v5 = vld [vmem:[#allocation10 + $0x34] sm:$0xf]  ;;  %v1320_v9 = vld [vmem:[#allocation10 + $0xfc] sm:$0xf0] }
  0x45   :  { %1014 = vmatpush.bf16.msra.mxu2 %v1415_v51  ;;  %1027 = vmatpush.bf16.msra.mxu3 %v1511_v54  ;;  %v1452_v51 = vld [vmem:[#allocation10 + $0x204] sm:$0xf0]  ;;  %v1671_v54 = vld [vmem:[#allocation10 + $0x2bc] sm:$0xf]  ;;  %v1641_v11 = vld [vmem:[#allocation10 + $0x1cc] sm:$0xf] }
  0x46   :  { %988 = vmatpush.bf16.msra.mxu0 %v1223_v52  ;;  %1001 = vmatpush.bf16.msra.mxu1 %v1319_v60  ;;  %v1347_v52 = vor.u32 %v1620_v47, %v1344_v49  ;;  %v1455_v53 = vor.u32 %v1647_v50, %v1452_v51  ;;  %v1551_v57 = vor.u32 %v1671_v54, %v1548_v55  ;;  %v1332_v60 = vld [vmem:[#allocation10 + $0x114] sm:$0xf0]  ;;  %v1587_v17 = vld [vmem:[#allocation10 + $0x1c] sm:$0xf]  ;;  %v1308_v21 = vld [vmem:[#allocation10 + $0xe4] sm:$0xf0] }
  0x47   :  { %v1428_v12 = vld [vmem:[#allocation10 + $0x1d4] sm:$0xf0]  ;;  %v1611_v19 = vld [vmem:[#allocation10 + $0xdc] sm:$0xf]  ;;  %v1416_v24 = vld [vmem:[#allocation10 + $0x1bc] sm:$0xf0] }
  0x48   :  { %v1524_v15 = vld [vmem:[#allocation10 + $0x294] sm:$0xf0]  ;;  %v1662_v25 = vld [vmem:[#allocation10 + $0x274] sm:$0xf]  ;;  %v1584_v29 = vld [vmem:[#allocation10 + $0x4] sm:$0xf] }
  0x49   :  { %1015 = vmatpush.bf16.msra.mxu2 %v1403_v61  ;;  %1028 = vmatpush.bf16.msra.mxu3 %v1499_v1  ;;  %v1239_v61 = vor.u32 %v1593_v56, %v1236_v58  ;;  %v1668_v1 = vld [vmem:[#allocation10 + $0x2a4] sm:$0xf]  ;;  %v1200_v30 = vld [vmem:[#allocation10 + $0xc] sm:$0xf0]  ;;  %v1635_v35 = vld [vmem:[#allocation10 + $0x19c] sm:$0xf] }
  0x4a   :  { %989 = vmatpush.bf16.msra.mxu0 %v1211_v62  ;;  %1002 = vmatpush.bf16.msra.mxu1 %v1307_v6  ;;  %v1335_v62 = vor.u32 %v1617_v59, %v1332_v60  ;;  %v1539_v4 = vor.u32 %v1668_v1, %v1536_v3  ;;  %v1224_v6 = vld [vmem:[#allocation10 + $0x3c] sm:$0xf0]  ;;  %v1296_v33 = vld [vmem:[#allocation10 + $0xcc] sm:$0xf0]  ;;  %v1659_v37 = vld [vmem:[#allocation10 + $0x25c] sm:$0xf] }
  0x4b   :  { %v1227_v8 = vor.u32 %v1590_v5, %v1224_v6  ;;  %v1500_v39 = vld [vmem:[#allocation10 + $0x264] sm:$0xf0]  ;;  %v1632_v41 = vld [vmem:[#allocation10 + $0x184] sm:$0xf]  ;;  %v1488_v45 = vld [vmem:[#allocation10 + $0x24c] sm:$0xf0] }
  0x4c   :  { %v1503_v40 = vor.u32 %v1659_v37, %v1500_v39  ;;  %v1607_v1 = vld [vmem:[#allocation10 + $0xb8] sm:$0xf0]  ;;  %v1470_v39 = vld [vmem:[#allocation10 + $0x218] sm:$0xf]  ;;  %vm1162_vm4 = vcmask 7168  }
  0x4d   :  { %1016 = vmatpush.bf16.msra.mxu2 %v1391_v23  ;;  %1029 = vmatpush.bf16.msra.mxu3 %v1487_v27  ;;  %v1638_v23 = vld [vmem:[#allocation10 + $0x1b4] sm:$0xf]  ;;  %v1512_v27 = vld [vmem:[#allocation10 + $0x27c] sm:$0xf0]  ;;  %v1631_v3 = vld [vmem:[#allocation10 + $0x178] sm:$0xf0] }
  0x4e   :  { %990 = vmatpush.bf16.msra.mxu0 %v1199_v7  ;;  %1003 = vmatpush.bf16.msra.mxu1 %v1295_v13  ;;  %v1614_v7 = vld [vmem:[#allocation10 + $0xf4] sm:$0xf]  ;;  %v1431_v13 = vor.u32 %v1641_v11, %v1428_v12  ;;  %v1419_v26 = vor.u32 %v1638_v23, %v1416_v24  ;;  %v1515_v28 = vor.u32 %v1662_v25, %v1512_v27  ;;  %v1604_v11 = vld [vmem:[#allocation10 + $0xa0] sm:$0xf0]  ;;  %v1482_v23 = vld [vmem:[#allocation10 + $0x230] sm:$0xf] }
  0x4f   :  { %v1655_v24 = vld [vmem:[#allocation10 + $0x238] sm:$0xf0]  ;;  %v1578_v25 = vld [vmem:[#allocation10 + $0x2f0] sm:$0xf] }
  0x51   :  { %1061 = vmatpush.bf16.msrb.mxu2 %v1479_v31  ;;  %1074 = vmatpush.bf16.msrb.mxu3 %v1575_v32  ;;  %v1608_v31 = vld [vmem:[#allocation10 + $0xc4] sm:$0xf]  ;;  %v1203_v32 = vor.u32 %v1584_v29, %v1200_v30  ;;  %v1679_v29 = vld [vmem:[#allocation10 + $0x2f8] sm:$0xf0]  ;;  %v1266_v30 = vld [vmem:[#allocation10 + $0x80] sm:$0xf] }
  0x52   :  { %1035 = vmatpush.bf16.msrb.mxu0 %v1287_v10  ;;  %1048 = vmatpush.bf16.msrb.mxu1 %v1383_v14  ;;  %v1323_v10 = vor.u32 %v1614_v7, %v1320_v9  ;;  %v1665_v14 = vld [vmem:[#allocation10 + $0x28c] sm:$0xf]  ;;  %v1299_v34 = vor.u32 %v1608_v31, %v1296_v33  ;;  %v1579_v37 = vor.u32 %v1679_v29, %v1578_v25  ;;  %v1640_v29 = vld [vmem:[#allocation10 + $0x1c0] sm:$0xf0] }
  0x53   :  { %v1527_v16 = vor.u32 %v1665_v14, %v1524_v15  ;;  %v1601_v31 = vld [vmem:[#allocation10 + $0x88] sm:$0xf0] }
  0x54   :  { %v1625_v33 = vld [vmem:[#allocation10 + $0x148] sm:$0xf0] }
  0x55   :  { %1062 = vmatpush.bf16.msrb.mxu2 %v1467_v42  ;;  %1075 = vmatpush.bf16.msrb.mxu3 %v1563_v44  ;;  %v1392_v42 = vld [vmem:[#allocation10 + $0x18c] sm:$0xf0]  ;;  %v1656_v44 = vld [vmem:[#allocation10 + $0x244] sm:$0xf]  ;;  %v1613_v25 = vld [vmem:[#allocation10 + $0xe8] sm:$0xf0] }
  0x56   :  { %1036 = vmatpush.bf16.msrb.mxu0 %v1275_v18  ;;  %1049 = vmatpush.bf16.msrb.mxu1 %v1371_v22  ;;  %v1212_v18 = vld [vmem:[#allocation10 + $0x24] sm:$0xf0]  ;;  %v1311_v22 = vor.u32 %v1611_v19, %v1308_v21  ;;  %v1395_v43 = vor.u32 %v1632_v41, %v1392_v42  ;;  %v1491_v46 = vor.u32 %v1656_v44, %v1488_v45  ;;  %v1566_v44 = vld [vmem:[#allocation10 + $0x2d8] sm:$0xf]  ;;  %v1676_v45 = vld [vmem:[#allocation10 + $0x2e0] sm:$0xf0] }
  0x57   :  { %v1215_v20 = vor.u32 %v1587_v17, %v1212_v18  ;;  %v1628_v17 = vld [vmem:[#allocation10 + $0x160] sm:$0xf0] }
  0x59   :  { %1063 = vmatpush.bf16.msrb.mxu2 %v1455_v53  ;;  %1076 = vmatpush.bf16.msrb.mxu3 %v1551_v57  ;;  %v313_v53 = vld [vmem:[%s1971_s4] sm:$0xf] }
  0x5a   :  { %1037 = vmatpush.bf16.msrb.mxu0 %v1263_v36  ;;  %1050 = vmatpush.bf16.msrb.mxu1 %v1359_v38  ;;  %v1404_v36 = vld [vmem:[#allocation10 + $0x1a4] sm:$0xf0]  ;;  %v315_v56 = vperm.slane %v313_v53, 0  ;;  %v316_v57 = vperm.slane %v313_v53, 1  ;;  %v317_v6 = vperm.slane %v313_v53, 2  ;;  %v318_v7 = vperm.slane %v313_v53, 3 }
  0x5b   :  { %v1407_v38 = vor.u32 %v1635_v35, %v1404_v36  ;;  %v1483_v36 = vor.u32 %v1655_v24, %v1482_v23  ;;  %v1567_v53 = vor.u32 %v1676_v45, %v1566_v44  ;;  %v1589_v23 = vld [vmem:[#allocation10 + $0x28] sm:$0xf0]  ;;  %v1314_v24 = vld [vmem:[#allocation10 + $0xe0] sm:$0xf] }
  0x5c   :  { %v1506_v44 = vld [vmem:[#allocation10 + $0x260] sm:$0xf]  ;;  %v1661_v45 = vld [vmem:[#allocation10 + $0x268] sm:$0xf0] }
  0x5d   :  { %1064 = vmatpush.bf16.msrb.mxu2 %v1443_v2  ;;  %1077 = vmatpush.bf16.msrb.mxu3 %v1539_v4  ;;  %v1386_v2 = vld [vmem:[#allocation10 + $0x170] sm:$0xf] }
  0x5e   :  { %1038 = vmatpush.bf16.msrb.mxu0 %v1251_v48  ;;  %1051 = vmatpush.bf16.msrb.mxu1 %v1347_v52  ;;  %v1387_v9 = vor.u32 %v1631_v3, %v1386_v2  ;;  %v1446_v2 = vld [vmem:[#allocation10 + $0x1e8] sm:$0xf]  ;;  %v1646_v3 = vld [vmem:[#allocation10 + $0x1f0] sm:$0xf0] }
  0x61   :  { %1065 = vmatpush.bf16.msrb.mxu2 %v1431_v13  ;;  %1078 = vmatpush.bf16.msrb.mxu3 %v1527_v16  ;;  %v1374_v16 = vld [vmem:[#allocation10 + $0x158] sm:$0xf] }
  0x62   :  { %1039 = vmatpush.bf16.msrb.mxu0 %v1239_v61  ;;  %1052 = vmatpush.bf16.msrb.mxu1 %v1335_v62  ;;  %v1290_v62 = vld [vmem:[#allocation10 + $0xb0] sm:$0xf] }
  0x65   :  { %1066 = vmatpush.bf16.msrb.mxu2 %v1419_v26  ;;  %1079 = vmatpush.bf16.msrb.mxu3 %v1515_v28  ;;  %v1375_v28 = vor.u32 %v1628_v17, %v1374_v16  ;;  %v1434_v16 = vld [vmem:[#allocation10 + $0x1d0] sm:$0xf]  ;;  %v1643_v17 = vld [vmem:[#allocation10 + $0x1d8] sm:$0xf0] }
  0x66   :  { %1040 = vmatpush.bf16.msrb.mxu0 %v1227_v8  ;;  %1053 = vmatpush.bf16.msrb.mxu1 %v1323_v10  ;;  %v1291_v8 = vor.u32 %v1607_v1, %v1290_v62  ;;  %v1278_v10 = vld [vmem:[#allocation10 + $0x98] sm:$0xf]  ;;  %v1338_v62 = vld [vmem:[#allocation10 + $0x110] sm:$0xf] }
  0x69   :  { %1067 = vmatpush.bf16.msrb.mxu2 %v1407_v38  ;;  %1080 = vmatpush.bf16.msrb.mxu3 %v1503_v40  ;;  %v1267_v38 = vor.u32 %v1601_v31, %v1266_v30  ;;  %v1652_v40 = vld [vmem:[#allocation10 + $0x220] sm:$0xf0]  ;;  %v1518_v30 = vld [vmem:[#allocation10 + $0x278] sm:$0xf] }
  0x6a   :  { %1041 = vmatpush.bf16.msrb.mxu0 %v1215_v20  ;;  %1054 = vmatpush.bf16.msrb.mxu1 %v1311_v22  ;;  %v1279_v22 = vor.u32 %v1604_v11, %v1278_v10  ;;  %v1326_v10 = vld [vmem:[#allocation10 + $0xf8] sm:$0xf]  ;;  %v1616_v11 = vld [vmem:[#allocation10 + $0x100] sm:$0xf0] }
  0x6b   :  { %v1664_v31 = vld [vmem:[#allocation10 + $0x280] sm:$0xf0] }
  0x6d   :  { %1068 = vmatpush.bf16.msrb.mxu2 %v1395_v43  ;;  %1081 = vmatpush.bf16.msrb.mxu3 %v1491_v46  ;;  %v1254_v46 = vld [vmem:[#allocation10 + $0x68] sm:$0xf] }
  0x6e   :  { %1042 = vmatpush.bf16.msrb.mxu0 %v1203_v32  ;;  %1055 = vmatpush.bf16.msrb.mxu1 %v1299_v34  ;;  %v1362_v32 = vld [vmem:[#allocation10 + $0x140] sm:$0xf] }
  0x6f   :  { %v1363_v43 = vor.u32 %v1625_v33, %v1362_v32  ;;  %v1315_v33 = vor.u32 %v1613_v25, %v1314_v24 }
  0xa4   :  { %v169_v47 = vpop.f32.mrf.mxu0  ;;  %v182_v48 = vpop.f32.mrf.mxu1 }
  0xab   :  { %v195_v49 = vpop.f32.mrf.mxu2  ;;  %v208_v50 = vpop.f32.mrf.mxu3 }
  0xac   :  { %v171_v51 = vpop.f32.mrf.mxu0  ;;  %v184_v52 = vpop.f32.mrf.mxu1 }
  0xad   :  { %v1622_v51 = vld [vmem:[#allocation10 + $0x130] sm:$0xf0]  ;;  %v1471_v52 = vor.u32 %v1652_v40, %v1470_v39  ;;  %v1519_v39 = vor.u32 %v1664_v31, %v1518_v30  ;;  %v1410_v40 = vld [vmem:[#allocation10 + $0x1a0] sm:$0xf] }
  0xb3   :  { %v197_v54 = vpop.f32.mrf.mxu2  ;;  %v210_v55 = vpop.f32.mrf.mxu3 }
  0xb4   :  { %v270_v58 = vpop.f32.mrf.mxu0  ;;  %v283_v59 = vpop.f32.mrf.mxu1  ;;  %v1458_v54 = vld [vmem:[#allocation10 + $0x200] sm:$0xf] }
  0xb5   :  { %v271_v60 = vadd.f32 %v270_v58, %v169_v47  ;;  %v284_v61 = vadd.f32 %v283_v59, %v182_v48  ;;  %v1554_v58 = vld [vmem:[#allocation10 + $0x2c0] sm:$0xf]  ;;  %v1673_v59 = vld [vmem:[#allocation10 + $0x2c8] sm:$0xf0] }
  0xb6   :  { %v1555_v1 = vor.u32 %v1673_v59, %v1554_v58 }
  0xb7   :  { %v323_v63 = vadd.f32 %v315_v56, %v271_v60  ;;  %v324_v0 = vadd.f32 %v316_v57, %v284_v61  ;;  %v1649_v57 = vld [vmem:[#allocation10 + $0x208] sm:$0xf0]  ;;  %v1242_v60 = vld [vmem:[#allocation10 + $0x50] sm:$0xf]  ;;  %v1595_v61 = vld [vmem:[#allocation10 + $0x58] sm:$0xf0] }
  0xb9   :  { %v327_v4 = vmax.f32 %v323_v63, 0.0  ;;  %v328_v5 = vmax.f32 %v324_v0, 0.0  ;;  %v1619_v63 = vld [vmem:[#allocation10 + $0x118] sm:$0xf0]  ;;  %v1459_v0 = vor.u32 %v1649_v57, %v1458_v54 }
  0xbb   :  { %v1941_v12 = vpack.c.bf16 %v327_v4, %v327_v4  ;;  %v1943_v13 = vpack.c.bf16 %v328_v5, %v328_v5  ;;  %v296_v14 = vpop.f32.mrf.mxu2  ;;  %v309_v15 = vpop.f32.mrf.mxu3  ;;  %v1542_v4 = vld [vmem:[#allocation10 + $0x2a8] sm:$0xf]  ;;  %v1670_v5 = vld [vmem:[#allocation10 + $0x2b0] sm:$0xf0] }
  0xbc   :  { %v297_v18 = vadd.f32 %v296_v14, %v195_v49  ;;  %v310_v19 = vadd.f32 %v309_v15, %v208_v50  ;;  %v272_v20 = vpop.f32.mrf.mxu0  ;;  %v285_v21 = vpop.f32.mrf.mxu1  ;;  %v1598_v49 = vld [vmem:[#allocation10 + $0x70] sm:$0xf0]  ;;  %v1350_v50 = vld [vmem:[#allocation10 + $0x128] sm:$0xf]  ;;  %v1447_v14 = vor.u32 %v1646_v3, %v1446_v2  ;;  %v1543_v15 = vor.u32 %v1670_v5, %v1542_v4 }
  0xbd   :  { %991 = vmatmul.bf16.vlgmr.msra.gmra.mxu0 %v1941_v12  ;;  %1004 = vmatmul.bf16.vlgmr.msra.gmra.mxu1 %v1943_v13  ;;  %v1255_v55 = vor.u32 %v1598_v49, %v1254_v46  ;;  %v1351_v56 = vor.u32 %v1622_v51, %v1350_v50  ;;  %v1327_v21 = vor.u32 %v1616_v11, %v1326_v10  ;;  %v1398_v50 = vld [vmem:[#allocation10 + $0x188] sm:$0xf]  ;;  %v1634_v51 = vld [vmem:[#allocation10 + $0x190] sm:$0xf0] }
  0xbe   :  { %v325_v26 = vadd.f32 %v317_v6, %v297_v18  ;;  %v326_v27 = vadd.f32 %v318_v7, %v310_v19  ;;  %1087 = vmatpush.bf16.msra.mxu0 %v1291_v8  ;;  %1100 = vmatpush.bf16.msra.mxu1 %v1387_v9  ;;  %v1243_v6 = vor.u32 %v1595_v61, %v1242_v60  ;;  %v1230_v8 = vld [vmem:[#allocation10 + $0x38] sm:$0xf]  ;;  %v1592_v9 = vld [vmem:[#allocation10 + $0x40] sm:$0xf0]  ;;  %v1530_v18 = vld [vmem:[#allocation10 + $0x290] sm:$0xf] }
  0xbf   :  { %v1339_v7 = vor.u32 %v1619_v63, %v1338_v62  ;;  %v1667_v19 = vld [vmem:[#allocation10 + $0x298] sm:$0xf0]  ;;  %v1231_v20 = vor.u32 %v1592_v9, %v1230_v8  ;;  %v1507_v49 = vor.u32 %v1661_v45, %v1506_v44  ;;  %v1399_v54 = vor.u32 %v1634_v51, %v1398_v50  ;;  %v1691_v44 = vld [vmem:[#allocation2] ss:$0 sm:$0xff] }
  0xc0   :  { %v329_v34 = vmax.f32 %v325_v26, 0.0  ;;  %v330_v35 = vmax.f32 %v326_v27, 0.0  ;;  %v1435_v26 = vor.u32 %v1643_v17, %v1434_v16  ;;  %v1531_v27 = vor.u32 %v1667_v19, %v1530_v18 }
  0xc2   :  { %v1947_v41 = vpack.c.bf16 %v329_v34, %v329_v34  ;;  %v1949_v42 = vpack.c.bf16 %v330_v35, %v330_v35  ;;  %1088 = vmatpush.bf16.msra.mxu0 %v1279_v22  ;;  %1101 = vmatpush.bf16.msra.mxu1 %v1375_v28  ;;  %v1218_v22 = vld [vmem:[#allocation10 + $0x20] sm:$0xf]  ;;  %v1422_v28 = vld [vmem:[#allocation10 + $0x1b8] sm:$0xf]  ;;  %v1206_v34 = vld [vmem:[#allocation10 + $0x8] sm:$0xf] }
  0xc3   :  { %v298_v47 = vpop.f32.mrf.mxu2  ;;  %v311_v48 = vpop.f32.mrf.mxu3  ;;  %v1219_v32 = vor.u32 %v1589_v23, %v1218_v22  ;;  %v1586_v35 = vld [vmem:[#allocation10 + $0x10] sm:$0xf0]  ;;  %v1142_v23 = vld [vmem:[#allocation11] sm:$0x7] }
  0xc4   :  { %1017 = vmatmul.bf16.vlgmr.msra.gmra.mxu2 %v1947_v41  ;;  %1030 = vmatmul.bf16.vlgmr.msra.gmra.mxu3 %v1949_v42  ;;  %v1207_v46 = vor.u32 %v1586_v35, %v1206_v34  ;;  %v1145_v25 = vperm.slane %v1142_v23, 1  ;;  %v1144_v30 = vperm.slane %v1142_v23, 0  ;;  %v1146_v34 = vperm.slane %v1142_v23, 2 }
  0xc5   :  { %1113 = vmatpush.bf16.msra.mxu2 %v1483_v36  ;;  %1126 = vmatpush.bf16.msra.mxu3 %v1579_v37  ;;  %v1302_v36 = vld [vmem:[#allocation10 + $0xc8] sm:$0xf]  ;;  %v1610_v37 = vld [vmem:[#allocation10 + $0xd0] sm:$0xf0] }
  0xc6   :  { %1089 = vmatpush.bf16.msra.mxu0 %v1267_v38  ;;  %1102 = vmatpush.bf16.msra.mxu1 %v1363_v43  ;;  %v1423_v38 = vor.u32 %v1640_v29, %v1422_v28  ;;  %v1637_v43 = vld [vmem:[#allocation10 + $0x1a8] sm:$0xf0]  ;;  %v1303_v47 = vor.u32 %v1610_v37, %v1302_v36 }
  0xc7   :  { %v1411_v48 = vor.u32 %v1637_v43, %v1410_v40 }
  0xc9   :  { %1114 = vmatpush.bf16.msra.mxu2 %v1471_v52  ;;  %1127 = vmatpush.bf16.msra.mxu3 %v1567_v53  ;;  %v1494_v52 = vld [vmem:[#allocation10 + $0x248] sm:$0xf]  ;;  %v1658_v53 = vld [vmem:[#allocation10 + $0x250] sm:$0xf0] }
  0xca   :  { %1090 = vmatpush.bf16.msra.mxu0 %v1255_v55  ;;  %1103 = vmatpush.bf16.msra.mxu1 %v1351_v56  ;;  %v1495_v55 = vor.u32 %v1658_v53, %v1494_v52 }
  0xcd   :  { %1115 = vmatpush.bf16.msra.mxu2 %v1459_v0  ;;  %1128 = vmatpush.bf16.msra.mxu3 %v1555_v1 }
  0xce   :  { %1043 = vmatmul.bf16.vlgmr.msrb.gmra.mxu0 %v1941_v12  ;;  %1056 = vmatmul.bf16.vlgmr.msrb.gmra.mxu1 %v1943_v13 }
  0xcf   :  { %1091 = vmatpush.bf16.msra.mxu0 %v1243_v6  ;;  %1104 = vmatpush.bf16.msra.mxu1 %v1339_v7 }
  0xd1   :  { %1116 = vmatpush.bf16.msra.mxu2 %v1447_v14  ;;  %1129 = vmatpush.bf16.msra.mxu3 %v1543_v15 }
  0xd3   :  { %1092 = vmatpush.bf16.msra.mxu0 %v1231_v20  ;;  %1105 = vmatpush.bf16.msra.mxu1 %v1327_v21 }
  0xd4   :  { %1069 = vmatmul.bf16.vlgmr.msrb.gmra.mxu2 %v1947_v41  ;;  %1082 = vmatmul.bf16.vlgmr.msrb.gmra.mxu3 %v1949_v42 }
  0xd5   :  { %1117 = vmatpush.bf16.msra.mxu2 %v1435_v26  ;;  %1130 = vmatpush.bf16.msra.mxu3 %v1531_v27 }
  0xd7   :  { %1093 = vmatpush.bf16.msra.mxu0 %v1219_v32  ;;  %1106 = vmatpush.bf16.msra.mxu1 %v1315_v33 }
  0xd9   :  { %1118 = vmatpush.bf16.msra.mxu2 %v1423_v38  ;;  %1131 = vmatpush.bf16.msra.mxu3 %v1519_v39 }
  0xdb   :  { %1094 = vmatpush.bf16.msra.mxu0 %v1207_v46  ;;  %1107 = vmatpush.bf16.msra.mxu1 %v1303_v47 }
  0xdd   :  { %1119 = vmatpush.bf16.msra.mxu2 %v1411_v48  ;;  %1132 = vmatpush.bf16.msra.mxu3 %v1507_v49 }
  0xde   :  { %1095 = vmatmul.bf16.vlgmr.msra.gmra.mxu0 %v1941_v12  ;;  %1108 = vmatmul.bf16.vlgmr.msra.gmra.mxu1 %v1943_v13  ;;  %v463_v12 = vld [vmem:[%s1973_s6] sm:$0x7] }
  0xdf   :  { %v466_v3 = vperm.slane %v463_v12, 1  ;;  %v467_v14 = vperm.slane %v463_v12, 2 }
  0xe1   :  { %1120 = vmatpush.bf16.msra.mxu2 %v1399_v54  ;;  %1133 = vmatpush.bf16.msra.mxu3 %v1495_v55 }
  0xe4   :  { %1121 = vmatmul.bf16.vlgmr.msra.gmra.mxu2 %v1947_v41  ;;  %1134 = vmatmul.bf16.vlgmr.msra.gmra.mxu3 %v1949_v42  ;;  %v465_v41 = vperm.slane %v463_v12, 0 }
 0x13a   :  { %v992_v56 = vpop.f32.mrf.mxu0  ;;  %v1005_v57 = vpop.f32.mrf.mxu1 }
 0x13b   :  { %v993_v6 = vadd.f32 %v992_v56, %v465_v41 }
 0x13d   :  { %v1006_v10 = vadd.f32 %v1005_v57, %v993_v6 }
 0x142   :  { %v994_v58 = vpop.f32.mrf.mxu0  ;;  %v1007_v59 = vpop.f32.mrf.mxu1 }
 0x147   :  { %v1018_v60 = vpop.f32.mrf.mxu2  ;;  %v1031_v61 = vpop.f32.mrf.mxu3 }
 0x148   :  { %v1019_v17 = vadd.f32 %v1018_v60, %v1006_v10 }
 0x14a   :  { %v1032_v22 = vadd.f32 %v1031_v61, %v1019_v17 }
 0x14b   :  { %v1044_v62 = vpop.f32.mrf.mxu0  ;;  %v1057_v63 = vpop.f32.mrf.mxu1 }
 0x14c   :  { %v1045_v5 = vadd.f32 %v1044_v62, %v466_v3  ;;  %v1139_v29 = vmax.f32 %v1032_v22, 0.0 }
 0x14e   :  { %v1058_v9 = vadd.f32 %v1057_v63, %v1045_v5  ;;  %v1150_v35 = vmul.f32 %v1144_v30, %v1139_v29 }
 0x14f   :  { %v1020_v0 = vpop.f32.mrf.mxu2  ;;  %v1033_v1 = vpop.f32.mrf.mxu3 }
 0x153   :  { %v1046_v13 = vpop.f32.mrf.mxu0  ;;  %v1059_v2 = vpop.f32.mrf.mxu1 }
 0x157   :  { %v1070_v4 = vpop.f32.mrf.mxu2  ;;  %v1083_v42 = vpop.f32.mrf.mxu3 }
 0x158   :  { %v1071_v11 = vadd.f32 %v1070_v4, %v1058_v9 }
 0x15a   :  { %v1084_v18 = vadd.f32 %v1083_v42, %v1071_v11 }
 0x15b   :  { %v1096_v7 = vpop.f32.mrf.mxu0  ;;  %v1109_v8 = vpop.f32.mrf.mxu1 }
 0x15c   :  { %v1097_v19 = vadd.f32 %v1096_v7, %v467_v14  ;;  %v1140_v24 = vmax.f32 %v1084_v18, 0.0 }
 0x15e   :  { %v1110_v26 = vadd.f32 %v1109_v8, %v1097_v19  ;;  %v1151_v32 = vmul.f32 %v1145_v25, %v1140_v24 }
 0x15f   :  { %v1072_v15 = vpop.f32.mrf.mxu2  ;;  %v1085_v16 = vpop.f32.mrf.mxu3 }
 0x160   :  { %v1153_v38 = vadd.f32 %v1151_v32, %v1150_v35 }
 0x163   :  { %v1098_v20 = vpop.f32.mrf.mxu0  ;;  %v1111_v21 = vpop.f32.mrf.mxu1 }
 0x167   :  { %v1122_v27 = vpop.f32.mrf.mxu2  ;;  %v1135_v28 = vpop.f32.mrf.mxu3 }
 0x168   :  { %v1123_v31 = vadd.f32 %v1122_v27, %v1110_v26 }
 0x16a   :  { %v1136_v33 = vadd.f32 %v1135_v28, %v1123_v31 }
 0x16c   :  { %v1141_v36 = vmax.f32 %v1136_v33, 0.0 }
 0x16e   :  { %v1152_v37 = vmul.f32 %v1146_v34, %v1141_v36 }
 0x16f   :  { %v1124_v39 = vpop.f32.mrf.mxu2  ;;  %v1137_v40 = vpop.f32.mrf.mxu3 }
 0x170   :  { %v1154_v43 = vadd.f32 %v1153_v38, %v1152_v37 }
 0x172   :  { %1155 = vadd.xlane.f32.xlu0 %v1154_v43 }
 0x1e5   :  { %v1156_v45 = vpop.xlane.xlu0 %1155 }
 0x1e6   :  { %v1161_v46 = vadd.f32 %v1691_v44, %v1156_v45 }
 0x1e8   :  { %1163 = vst.msk [vmem:[%s1976_s9] sm:$0xff] %vm1162_vm4, %v1161_v46 }
 0x1e9   :  { %1168 = vsyncpa [#allocation4], 1 }
 0x1ea   :  { %1169 = vsyncpa [#allocation6], 1 }
 0x1eb   :  { %1170 = vsyncpa [#allocation9], 1 }
 0x1ec   :  { %1171 = vsyncpa [#allocation12], 1 }

</bundles_post_ra>
